<compile_context>
chip_gen: v7x
topology: tpu7x:2x2x1
jax: 0.10.0
libtpu: 0.0.40
codegen_flags: <defaults>
</compile_context>

<pallas_src>
import functools

import jax
import jax.numpy as jnp
from jax.experimental import pallas as pl
from jax.experimental.pallas import tpu as pltpu


# --------------------------------------------------------------------------- helpers
def _round_up(x, m):
    return -(-x // m) * m


def _cdiv(a, b):
    return -(-a // b)


def _pad2(a, rows, cols):
    r, c = a.shape
    if r == rows and c == cols:
        return a
    return jnp.pad(a, ((0, rows - r), (0, cols - c)))


def _vmem_capacity_bytes():
    """Physical per-core VMEM (64 MiB v7x, 128 MiB v5e/v6e); conservative fallback."""
    try:
        info = pltpu.get_tpu_info()
        cap = int(getattr(info, "vmem_capacity_bytes", 0) or 0)
        if cap > 0:
            return cap
    except Exception:
        pass
    return 64 << 20


def _apply_activation(y, activation):
    if activation == "relu":
        return jnp.maximum(y, 0.0)
    if activation == "tanh":
        return jnp.tanh(y)
    if activation == "sigmoid":
        return jax.nn.sigmoid(y)
    return y


def _block_spec(shape, index_map, mode=None):
    if mode is None:
        return pl.BlockSpec(shape, index_map)
    return pl.BlockSpec(shape, index_map, pipeline_mode=mode)


# --------------------------------------------------------------------------- fused kernel
def _fused_kernel(x_ref, w1_ref, b1_ref, w2_ref, b2_ref, o_ref, h_ref, *, binary):
    """Fused encoder+decoder.  Grid = (batch_tiles, feature_tiles).

    The encoder only depends on the batch tile, so it runs once per batch tile
    (feature index j == 0) into the VMEM scratch `h_ref` (stored in the
    decoder-matmul dtype) and is reused for every decoder feature tile.
    """
    j = pl.program_id(1)

    @pl.when(j == 0)
    def _():
        h = jnp.dot(x_ref[...], w1_ref[...], preferred_element_type=jnp.float32)
        h = h + b1_ref[...]                       # f32 bias
        h = jnp.tanh(h) if binary else jnp.maximum(h, 0.0)
        h_ref[...] = h.astype(h_ref.dtype)        # single cast to compute dtype

    y = jnp.dot(h_ref[...], w2_ref[...], preferred_element_type=jnp.float32)
    y = y + b2_ref[...]
    y = jax.nn.sigmoid(y) if binary else jnp.maximum(y, 0.0)
    o_ref[...] = y.astype(o_ref.dtype)


def _plan_fused(bt, d_pad, h_pad, csize, osize, budget, single_buffer):
    """Pick the decoder feature tile for the fused kernel.

    Returns (tile_n, vmem_bytes) or None if even a 128-wide tile doesn't fit."""
    wbuf = 1 if single_buffer else 2

    def usage(tile_n, w2buf):
        return (2 * bt * d_pad * csize                         # x tile (double-buffered)
                + wbuf * (d_pad * h_pad * csize + h_pad * 4)   # w1 + b1 (resident)
                + w2buf * (h_pad * tile_n * csize + tile_n * 4)  # w2 / b2 tile
                + 2 * bt * tile_n * osize                      # out tile
                + bt * h_pad * csize)                          # hidden scratch

    # Prefer full residency: w2 is read from HBM exactly once.
    if usage(d_pad, wbuf) <= budget:
        return d_pad, usage(d_pad, wbuf)
    # Otherwise the largest 128-multiple divisor of d_pad that fits
    # (tiled w2 gets re-streamed per batch tile and needs double-buffering).
    candidates = sorted(
        {d_pad // k for k in range(2, d_pad // 128 + 1)
         if d_pad % k == 0 and (d_pad // k) % 128 == 0},
        reverse=True)
    for t in candidates:
        if usage(t, 2) <= budget:
            return t, usage(t, 2)
    return None


def _run_fused(xc, w1c, b1f, w2c, b2f, *, binary, bt, tile_n, vmem_bytes,
               out_dtype, single_buffer, vmem_cap):
    b_pad, d_pad = xc.shape
    h_pad = w1c.shape[1]
    n_bt, n_ft = b_pad // bt, d_pad // tile_n

    # Resident (constant-block-index) operands don't need a second pipeline buffer.
    res_mode = pl.Buffered(1) if single_buffer else None
    w2_mode = res_mode if n_ft == 1 else None

    csize = xc.dtype.itemsize
    osize = jnp.dtype(out_dtype).itemsize
    w2_reads = 1 if n_ft == 1 else n_bt
    cost = pl.CostEstimate(
        flops=int(4 * b_pad * d_pad * h_pad),
        transcendentals=int(b_pad * (h_pad + d_pad)) if binary else 0,
        bytes_accessed=int(
            b_pad * d_pad * csize                              # x read
            + d_pad * h_pad * csize + h_pad * 4                # w1 + b1 (once)
            + w2_reads * (h_pad * d_pad * csize + d_pad * 4)   # w2 + b2 (re-streamed if tiled)
            + b_pad * d_pad * osize))                          # output write

    vmem_limit = int(min(max(vmem_bytes + (8 << 20), 32 << 20), vmem_cap - (4 << 20)))

    return pl.pallas_call(
        functools.partial(_fused_kernel, binary=binary),
        out_shape=jax.ShapeDtypeStruct((b_pad, d_pad), out_dtype),
        grid_spec=pltpu.PrefetchScalarGridSpec(
            num_scalar_prefetch=0,
            grid=(n_bt, n_ft),
            in_specs=[
                # batch-tiled activations (constant across feature axis -> no re-DMA)
                _block_spec((bt, d_pad), lambda i, j: (i, 0)),
                # encoder weights / bias: resident
                _block_spec((d_pad, h_pad), lambda i, j: (0, 0), res_mode),
                _block_spec((1, h_pad), lambda i, j: (0, 0), res_mode),
                # decoder weights / bias: resident when n_ft == 1, else feature-tiled
                _block_spec((h_pad, tile_n), lambda i, j: (0, j), w2_mode),
                _block_spec((1, tile_n), lambda i, j: (0, j), w2_mode),
            ],
            out_specs=pl.BlockSpec((bt, tile_n), lambda i, j: (i, j)),
            scratch_shapes=[pltpu.VMEM((bt, h_pad), xc.dtype)],
        ),
        compiler_params=pltpu.CompilerParams(
            dimension_semantics=("parallel", "arbitrary"),
            vmem_limit_bytes=vmem_limit,
        ),
        cost_estimate=cost,
    )(xc, w1c, b1f, w2c, b2f)


# --------------------------------------------------------------------------- split path
def _linear_act_kernel(x_ref, w_ref, b_ref, o_ref, acc_ref, *, activation):
    """y = act(x @ w + b), grid = (batch_tiles, out_tiles, k_tiles)."""
    k = pl.program_id(2)

    @pl.when(k == 0)
    def _():
        acc_ref[...] = jnp.zeros_like(acc_ref)

    acc_ref[...] += jnp.dot(x_ref[...], w_ref[...], preferred_element_type=jnp.float32)

    @pl.when(k == pl.num_programs(2) - 1)
    def _():
        y = _apply_activation(acc_ref[...] + b_ref[...], activation)
        o_ref[...] = y.astype(o_ref.dtype)


def _pick_tile(dim, cap=512):
    if dim <= cap:
        return dim
    for t in range(cap, 127, -128):
        if dim % t == 0:
            return t
    return 128  # dim is always a multiple of 128 here


def _linear_act(x, w, b, *, activation, out_dtype, bt, vmem_cap):
    b_pad, k_dim = x.shape
    n_dim = w.shape[1]
    tk = _pick_tile(k_dim)
    tn = _pick_tile(n_dim)
    csize = x.dtype.itemsize
    osize = jnp.dtype(out_dtype).itemsize

    usage = (2 * bt * tk * csize + 2 * tk * tn * csize + 2 * tn * 4
             + 2 * bt * tn * osize + bt * tn * 4)
    vmem_limit = int(min(max(usage + (8 << 20), 32 << 20), vmem_cap - (4 << 20)))

    cost = pl.CostEstimate(
        flops=int(2 * b_pad * k_dim * n_dim),
        transcendentals=int(b_pad * n_dim) if activation in ("tanh", "sigmoid") else 0,
        bytes_accessed=int((n_dim // tn) * b_pad * k_dim * csize
                           + (b_pad // bt) * k_dim * n_dim * csize
                           + n_dim * 4 + b_pad * n_dim * osize))

    return pl.pallas_call(
        functools.partial(_linear_act_kernel, activation=activation),
        out_shape=jax.ShapeDtypeStruct((b_pad, n_dim), out_dtype),
        grid_spec=pltpu.PrefetchScalarGridSpec(
            num_scalar_prefetch=0,
            grid=(b_pad // bt, n_dim // tn, k_dim // tk),
            in_specs=[
                pl.BlockSpec((bt, tk), lambda i, j, k: (i, k)),
                pl.BlockSpec((tk, tn), lambda i, j, k: (k, j)),
                pl.BlockSpec((1, tn), lambda i, j, k: (0, j)),
            ],
            out_specs=pl.BlockSpec((bt, tn), lambda i, j, k: (i, j)),
            scratch_shapes=[pltpu.VMEM((bt, tn), jnp.float32)],
        ),
        compiler_params=pltpu.CompilerParams(
            dimension_semantics=("parallel", "parallel", "arbitrary"),
            vmem_limit_bytes=vmem_limit,
        ),
        cost_estimate=cost,
    )(x, w, b)


# --------------------------------------------------------------------------- forward
def autoencoder_forward(x, w1, b1, w2, b2, *, binary=False,
                        compute_dtype=jnp.bfloat16, batch_tile=None,
                        force_split=False):
    """medgan Autoencoder forward: act2(act1(x @ w1 + b1) @ w2 + b2).

    x : [B, input_size]       (output keeps this dtype)
    w1: [input_size, hidden]  (transpose of PyTorch Linear weight)
    b1: [hidden] / [1, hidden]
    w2: [hidden, input_size]
    b2: [input_size] / [1, input_size]

    Matmuls use `compute_dtype` (bf16 by default) operands with f32
    accumulation; biases and activations stay in f32.
    """
    B, d_in = x.shape
    hid = w1.shape[1]
    out_dtype = x.dtype
    cdt = jnp.dtype(compute_dtype)
    csize = cdt.itemsize
    osize = jnp.dtype(out_dtype).itemsize

    # Lane-align both matmul minor dims. Padding is semantically transparent:
    # zero x cols / w1 rows add nothing; zero w1 cols + zero b1 give zero
    # (relu/tanh) hidden cols which meet zero w2 rows; padded outputs are sliced.
    d_pad = _round_up(d_in, 128)
    h_pad = _round_up(hid, 128)

    # Batch tile: MXU-sized, sublane-aligned, low pad waste, and >=2 tiles when
    # possible so the "parallel" axis can feed both TensorCores on 2-TC chips.
    sublane = {1: 32, 2: 16}.get(csize, 8)
    desired = batch_tile if batch_tile is not None else (256 if B >= 512 else 128)
    desired = max(sublane, int(desired))
    n_bt = max(1, _cdiv(B, desired))
    if n_bt == 1 and B >= 2 * sublane:
        n_bt = 2
    bt = _round_up(_cdiv(B, n_bt), sublane)
    b_pad = n_bt * bt

    xc = _pad2(x, b_pad, d_pad).astype(cdt)
    w1c = _pad2(w1, d_pad, h_pad).astype(cdt)
    w2c = _pad2(w2, h_pad, d_pad).astype(cdt)
    b1f = _pad2(b1.reshape(1, -1), 1, h_pad).astype(jnp.float32)
    b2f = _pad2(b2.reshape(1, -1), 1, d_pad).astype(jnp.float32)

    vmem_cap = _vmem_capacity_bytes()
    budget = vmem_cap - (12 << 20)          # plan with headroom below physical VMEM

    out = None
    if not force_split:
        # Fused single-pass kernel: weights resident, encoder computed once per
        # batch tile.  Try single-buffered resident weights first, then plain
        # double-buffered specs; anything that doesn't fit/compile falls through
        # to the two-kernel split.
        for single_buffer in (True, False):
            plan = _plan_fused(bt, d_pad, h_pad, csize, osize, budget, single_buffer)
            if plan is None:
                continue
            tile_n, vmem_bytes = plan
            try:
                out = _run_fused(xc, w1c, b1f, w2c, b2f, binary=binary, bt=bt,
                                 tile_n=tile_n, vmem_bytes=vmem_bytes,
                                 out_dtype=out_dtype, single_buffer=single_buffer,
                                 vmem_cap=vmem_cap)
                break
            except Exception:
                out = None

    if out is None:
        # Two-kernel split: every weight is read from HBM exactly once; only the
        # small [B, hidden] activation makes an extra HBM round trip.
        enc_act = "tanh" if binary else "relu"
        dec_act = "sigmoid" if binary else "relu"
        h = _linear_act(xc, w1c, b1f, activation=enc_act, out_dtype=cdt,
                        bt=bt, vmem_cap=vmem_cap)
        out = _linear_act(h, w2c, b2f, activation=dec_act, out_dtype=out_dtype,
                          bt=bt, vmem_cap=vmem_cap)

    if b_pad != B or d_pad != d_in:
        out = out[:B, :d_in]
    return out


# --------------------------------------------------------------------------- reference / init
def init_params(key, input_size, hidden_size, dtype=jnp.float32):
    """PyTorch nn.Linear-style init: U(-1/sqrt(fan_in), 1/sqrt(fan_in)).
    Weights stored as [in_features, out_features] (transpose of PyTorch)."""
    k1, k2, k3, k4 = jax.random.split(key, 4)
    bound1 = 1.0 / (input_size ** 0.5)
    bound2 = 1.0 / (hidden_size ** 0.5)
    w1 = jax.random.uniform(k1, (input_size, hidden_size), dtype, -bound1, bound1)
    b1 = jax.random.uniform(k2, (1, hidden_size), dtype, -bound1, bound1)
    w2 = jax.random.uniform(k3, (hidden_size, input_size), dtype, -bound2, bound2)
    b2 = jax.random.uniform(k4, (1, input_size), dtype, -bound2, bound2)
    return w1, b1, w2, b2


def reference_forward(x, w1, b1, w2, b2, *, binary=False, compute_dtype=None):
    """Pure-JAX reference.  With compute_dtype set it mirrors the kernel's
    mixed-precision contract (compute_dtype operands, f32 accumulation)."""
    if compute_dtype is not None:
        x_m, w1_m, w2_m = (a.astype(compute_dtype) for a in (x, w1, w2))
    else:
        x_m, w1_m, w2_m = x, w1, w2
    h = jnp.dot(x_m, w1_m, preferred_element_type=jnp.float32) + b1.astype(jnp.float32)
    h = jnp.tanh(h) if binary else jnp.maximum(h, 0.0)
    if compute_dtype is not None:
        h = h.astype(compute_dtype)
    y = jnp.dot(h, w2_m, preferred_element_type=jnp.float32) + b2.astype(jnp.float32)
    y = jax.nn.sigmoid(y) if binary else jnp.maximum(y, 0.0)
    return y.astype(x.dtype)


# --------------------------------------------------------------------------- demo / tests
if __name__ == "__main__":
    key = jax.random.PRNGKey(0)
    kx1, kx2, kx3, kx4, kp1, kp3, kp4 = jax.random.split(key, 7)

    def check(out, ref, tag):
        assert out.shape == ref.shape, f"{tag}: shape {out.shape} vs {ref.shape}"
        assert jnp.allclose(out, ref, atol=5e-3, rtol=5e-3), f"{tag}: numerics mismatch"

    # --- 1. small demo shapes, ReLU path (fused kernel, fully resident) -------
    B, D, H = 8, 256, 128
    x = jax.random.normal(kx1, (B, D), jnp.float32)
    w1, b1, w2, b2 = init_params(kp1, D, H)
    out = jax.block_until_ready(autoencoder_forward(x, w1, b1, w2, b2, binary=False))
    check(out, reference_forward(x, w1, b1, w2, b2, binary=False,
                                 compute_dtype=jnp.bfloat16), "relu")

    # --- 2. binary=True (tanh/sigmoid), ragged batch ---------------------------
    x2 = jax.random.normal(kx2, (5, D), jnp.float32)
    out2 = jax.block_until_ready(autoencoder_forward(x2, w1, b1, w2, b2, binary=True))
    check(out2, reference_forward(x2, w1, b1, w2, b2, binary=True,
                                  compute_dtype=jnp.bfloat16), "binary")

    # --- 3. awkward dims: D/H padded to 128 multiples, low-waste batch tiling --
    B3, D3, H3 = 200, 1000, 96
    x3 = jax.random.normal(kx3, (B3, D3), jnp.float32)
    p3 = init_params(kp3, D3, H3)
    out3 = jax.block_until_ready(autoencoder_forward(x3, *p3, binary=False))
    check(out3, reference_forward(x3, *p3, binary=False,
                                  compute_dtype=jnp.bfloat16), "padded")

    # --- 4. two-kernel split path (forced; used when weights don't fit VMEM) ---
    x4 = jax.random.normal(kx4, (16, 384), jnp.float32)
    p4 = init_params(kp4, 384, 128)
    out4 = jax.block_until_ready(autoencoder_forward(x4, *p4, binary=True,
                                                     force_split=True))
    check(out4, reference_forward(x4, *p4, binary=True,
                                  compute_dtype=jnp.bfloat16), "split")

    print("KERNEL_OK")
</pallas_src>

<mosaic_0001>
module attributes {stable_mosaic.version = 11 : i64} {
  func.func @_fused_kernel(%arg0: i32, %arg1: i32, %arg2: memref<16x256xbf16, #tpu.memory_space<vmem>>, %arg3: memref<256x128xbf16, #tpu.memory_space<vmem>>, %arg4: memref<1x128xf32, #tpu.memory_space<vmem>>, %arg5: memref<128x256xbf16, #tpu.memory_space<vmem>>, %arg6: memref<1x256xf32, #tpu.memory_space<vmem>>, %arg7: memref<16x256xf32, #tpu.memory_space<vmem>>, %arg8: memref<16x128xbf16, #tpu.memory_space<vmem>>) attributes {dimension_semantics = [#tpu.dimension_semantics<parallel>, #tpu.dimension_semantics<arbitrary>], iteration_bounds = array<i64: 1, 1>, scalar_prefetch = 0 : i64, scratch_operands = 1 : i64, tpu.core_type = #tpu.core_type<tc>, window_params = [{transform_indices = @transform_0, window_bounds = array<i64: 16, 256>}, {pipeline_mode = #tpu.pipeline_mode<synchronous>, transform_indices = @transform_1, window_bounds = array<i64: 256, 128>}, {pipeline_mode = #tpu.pipeline_mode<synchronous>, transform_indices = @transform_2, window_bounds = array<i64: 1, 128>}, {pipeline_mode = #tpu.pipeline_mode<synchronous>, transform_indices = @transform_3, window_bounds = array<i64: 128, 256>}, {pipeline_mode = #tpu.pipeline_mode<synchronous>, transform_indices = @transform_4, window_bounds = array<i64: 1, 256>}, {transform_indices = @transform_5, window_bounds = array<i64: 16, 256>}]} {
    %c0_i32 = arith.constant 0 : i32
    %0 = arith.cmpi eq, %arg1, %c0_i32 : i32
    %1 = arith.extui %0 : i1 to i32
    %c0_i32_0 = arith.constant 0 : i32
    %2 = arith.cmpi ne, %1, %c0_i32_0 : i32
    scf.if %2 {
      %c0_9 = arith.constant 0 : index
      %c0_10 = arith.constant 0 : index
      %12 = vector.load %arg2[%c0_9, %c0_10] : memref<16x256xbf16, #tpu.memory_space<vmem>>, vector<16x256xbf16>
      %c0_11 = arith.constant 0 : index
      %c0_12 = arith.constant 0 : index
      %13 = vector.load %arg3[%c0_11, %c0_12] : memref<256x128xbf16, #tpu.memory_space<vmem>>, vector<256x128xbf16>
      %cst_13 = arith.constant dense<0.000000e+00> : vector<16x128xf32>
      %14 = tpu.matmul %12, %13, %cst_13 {dimension_numbers = #tpu.dot_dimension_numbers<[1], [0], [0], [1], [0, 0, 1, 1], [], []>} : vector<16x256xbf16>, vector<256x128xbf16>, vector<16x128xf32> -> vector<16x128xf32>
      %c0_14 = arith.constant 0 : index
      %c0_15 = arith.constant 0 : index
      %15 = vector.load %arg4[%c0_14, %c0_15] : memref<1x128xf32, #tpu.memory_space<vmem>>, vector<1x128xf32>
      %16 = vector.broadcast %15 : vector<1x128xf32> to vector<16x128xf32>
      %17 = arith.addf %14, %16 : vector<16x128xf32>
      %cst_16 = arith.constant 0.000000e+00 : f32
      %18 = vector.broadcast %cst_16 : f32 to vector<16x128xf32>
      %19 = arith.maximumf %17, %18 : vector<16x128xf32>
      %20 = arith.truncf %19 : vector<16x128xf32> to vector<16x128xbf16>
      %c0_17 = arith.constant 0 : index
      %c0_18 = arith.constant 0 : index
      %21 = vector.load %arg8[%c0_17, %c0_18] : memref<16x128xbf16, #tpu.memory_space<vmem>>, vector<16x128xbf16>
      tpu.vector_store %arg8[%c0_17, %c0_18], %20 {strides = array<i32>} : memref<16x128xbf16, #tpu.memory_space<vmem>>, vector<16x128xbf16>,
    } else {
    }
    %c0 = arith.constant 0 : index
    %c0_1 = arith.constant 0 : index
    %3 = vector.load %arg8[%c0, %c0_1] : memref<16x128xbf16, #tpu.memory_space<vmem>>, vector<16x128xbf16>
    %c0_2 = arith.constant 0 : index
    %c0_3 = arith.constant 0 : index
    %4 = vector.load %arg5[%c0_2, %c0_3] : memref<128x256xbf16, #tpu.memory_space<vmem>>, vector<128x256xbf16>
    %cst = arith.constant dense<0.000000e+00> : vector<16x256xf32>
    %5 = tpu.matmul %3, %4, %cst {dimension_numbers = #tpu.dot_dimension_numbers<[1], [0], [0], [1], [0, 0, 1, 1], [], []>} : vector<16x128xbf16>, vector<128x256xbf16>, vector<16x256xf32> -> vector<16x256xf32>
    %c0_4 = arith.constant 0 : index
    %c0_5 = arith.constant 0 : index
    %6 = vector.load %arg6[%c0_4, %c0_5] : memref<1x256xf32, #tpu.memory_space<vmem>>, vector<1x256xf32>
    %7 = vector.broadcast %6 : vector<1x256xf32> to vector<16x256xf32>
    %8 = arith.addf %5, %7 : vector<16x256xf32>
    %cst_6 = arith.constant 0.000000e+00 : f32
    %9 = vector.broadcast %cst_6 : f32 to vector<16x256xf32>
    %10 = arith.maximumf %8, %9 : vector<16x256xf32>
    %c0_7 = arith.constant 0 : index
    %c0_8 = arith.constant 0 : index
    %11 = vector.load %arg7[%c0_7, %c0_8] : memref<16x256xf32, #tpu.memory_space<vmem>>, vector<16x256xf32>
    tpu.vector_store %arg7[%c0_7, %c0_8], %10 {strides = array<i32>} : memref<16x256xf32, #tpu.memory_space<vmem>>, vector<16x256xf32>,
    return
  }
  func.func @transform_0(%arg0: i32, %arg1: i32) -> (i32, i32) {
    %c0_i32 = arith.constant 0 : i32
    %c0_i32_0 = arith.constant 0 : i32
    return %arg0, %c0_i32 : i32, i32
  }
  func.func @transform_1(%arg0: i32, %arg1: i32) -> (i32, i32) {
    %c0_i32 = arith.constant 0 : i32
    %c0_i32_0 = arith.constant 0 : i32
    %c0_i32_1 = arith.constant 0 : i32
    return %c0_i32, %c0_i32_0 : i32, i32
  }
  func.func @transform_2(%arg0: i32, %arg1: i32) -> (i32, i32) {
    %c0_i32 = arith.constant 0 : i32
    %c0_i32_0 = arith.constant 0 : i32
    %c0_i32_1 = arith.constant 0 : i32
    return %c0_i32, %c0_i32_0 : i32, i32
  }
  func.func @transform_3(%arg0: i32, %arg1: i32) -> (i32, i32) {
    %c0_i32 = arith.constant 0 : i32
    %c0_i32_0 = arith.constant 0 : i32
    return %c0_i32, %arg1 : i32, i32
  }
  func.func @transform_4(%arg0: i32, %arg1: i32) -> (i32, i32) {
    %c0_i32 = arith.constant 0 : i32
    %c0_i32_0 = arith.constant 0 : i32
    return %c0_i32, %arg1 : i32, i32
  }
  func.func @transform_5(%arg0: i32, %arg1: i32) -> (i32, i32) {
    %c0_i32 = arith.constant 0 : i32
    return %arg0, %arg1 : i32, i32
  }
}

module attributes {stable_mosaic.version = 11 : i64} {
  func.func @_fused_kernel(%arg0: i32, %arg1: i32, %arg2: memref<16x256xbf16, #tpu.memory_space<vmem>>, %arg3: memref<256x128xbf16, #tpu.memory_space<vmem>>, %arg4: memref<1x128xf32, #tpu.memory_space<vmem>>, %arg5: memref<128x256xbf16, #tpu.memory_space<vmem>>, %arg6: memref<1x256xf32, #tpu.memory_space<vmem>>, %arg7: memref<16x256xf32, #tpu.memory_space<vmem>>, %arg8: memref<16x128xbf16, #tpu.memory_space<vmem>>) attributes {dimension_semantics = [#tpu.dimension_semantics<parallel>, #tpu.dimension_semantics<arbitrary>], iteration_bounds = array<i64: 1, 1>, scalar_prefetch = 0 : i64, scratch_operands = 1 : i64, tpu.core_type = #tpu.core_type<tc>, window_params = [{transform_indices = @transform_0, window_bounds = array<i64: 16, 256>}, {pipeline_mode = #tpu.pipeline_mode<synchronous>, transform_indices = @transform_1, window_bounds = array<i64: 256, 128>}, {pipeline_mode = #tpu.pipeline_mode<synchronous>, transform_indices = @transform_2, window_bounds = array<i64: 1, 128>}, {transform_indices = @transform_3, window_bounds = array<i64: 128, 256>}, {transform_indices = @transform_4, window_bounds = array<i64: 1, 256>}, {transform_indices = @transform_5, window_bounds = array<i64: 16, 256>}]} {
    %c0_i32 = arith.constant 0 : i32
    %0 = arith.cmpi eq, %arg1, %c0_i32 : i32
    %1 = arith.extui %0 : i1 to i32
    %c0_i32_0 = arith.constant 0 : i32
    %2 = arith.cmpi ne, %1, %c0_i32_0 : i32
    scf.if %2 {
      %c0_9 = arith.constant 0 : index
      %c0_10 = arith.constant 0 : index
      %12 = vector.load %arg2[%c0_9, %c0_10] : memref<16x256xbf16, #tpu.memory_space<vmem>>, vector<16x256xbf16>
      %c0_11 = arith.constant 0 : index
      %c0_12 = arith.constant 0 : index
      %13 = vector.load %arg3[%c0_11, %c0_12] : memref<256x128xbf16, #tpu.memory_space<vmem>>, vector<256x128xbf16>
      %cst_13 = arith.constant dense<0.000000e+00> : vector<16x128xf32>
      %14 = tpu.matmul %12, %13, %cst_13 {dimension_numbers = #tpu.dot_dimension_numbers<[1], [0], [0], [1], [0, 0, 1, 1], [], []>} : vector<16x256xbf16>, vector<256x128xbf16>, vector<16x128xf32> -> vector<16x128xf32>
      %c0_14 = arith.constant 0 : index
      %c0_15 = arith.constant 0 : index
      %15 = vector.load %arg4[%c0_14, %c0_15] : memref<1x128xf32, #tpu.memory_space<vmem>>, vector<1x128xf32>
      %16 = vector.broadcast %15 : vector<1x128xf32> to vector<16x128xf32>
      %17 = arith.addf %14, %16 : vector<16x128xf32>
      %cst_16 = arith.constant 0.000000e+00 : f32
      %18 = vector.broadcast %cst_16 : f32 to vector<16x128xf32>
      %19 = arith.maximumf %17, %18 : vector<16x128xf32>
      %20 = arith.truncf %19 : vector<16x128xf32> to vector<16x128xbf16>
      %c0_17 = arith.constant 0 : index
      %c0_18 = arith.constant 0 : index
      %21 = vector.load %arg8[%c0_17, %c0_18] : memref<16x128xbf16, #tpu.memory_space<vmem>>, vector<16x128xbf16>
      tpu.vector_store %arg8[%c0_17, %c0_18], %20 {strides = array<i32>} : memref<16x128xbf16, #tpu.memory_space<vmem>>, vector<16x128xbf16>,
    } else {
    }
    %c0 = arith.constant 0 : index
    %c0_1 = arith.constant 0 : index
    %3 = vector.load %arg8[%c0, %c0_1] : memref<16x128xbf16, #tpu.memory_space<vmem>>, vector<16x128xbf16>
    %c0_2 = arith.constant 0 : index
    %c0_3 = arith.constant 0 : index
    %4 = vector.load %arg5[%c0_2, %c0_3] : memref<128x256xbf16, #tpu.memory_space<vmem>>, vector<128x256xbf16>
    %cst = arith.constant dense<0.000000e+00> : vector<16x256xf32>
    %5 = tpu.matmul %3, %4, %cst {dimension_numbers = #tpu.dot_dimension_numbers<[1], [0], [0], [1], [0, 0, 1, 1], [], []>} : vector<16x128xbf16>, vector<128x256xbf16>, vector<16x256xf32> -> vector<16x256xf32>
    %c0_4 = arith.constant 0 : index
    %c0_5 = arith.constant 0 : index
    %6 = vector.load %arg6[%c0_4, %c0_5] : memref<1x256xf32, #tpu.memory_space<vmem>>, vector<1x256xf32>
    %7 = vector.broadcast %6 : vector<1x256xf32> to vector<16x256xf32>
    %8 = arith.addf %5, %7 : vector<16x256xf32>
    %cst_6 = arith.constant 0.000000e+00 : f32
    %9 = vector.broadcast %cst_6 : f32 to vector<16x256xf32>
    %10 = arith.maximumf %8, %9 : vector<16x256xf32>
    %c0_7 = arith.constant 0 : index
    %c0_8 = arith.constant 0 : index
    %11 = vector.load %arg7[%c0_7, %c0_8] : memref<16x256xf32, #tpu.memory_space<vmem>>, vector<16x256xf32>
    tpu.vector_store %arg7[%c0_7, %c0_8], %10 {strides = array<i32>} : memref<16x256xf32, #tpu.memory_space<vmem>>, vector<16x256xf32>,
    return
  }
  func.func @transform_0(%arg0: i32, %arg1: i32) -> (i32, i32) {
    %c0_i32 = arith.constant 0 : i32
    %c0_i32_0 = arith.constant 0 : i32
    return %arg0, %c0_i32 : i32, i32
  }
  func.func @transform_1(%arg0: i32, %arg1: i32) -> (i32, i32) {
    %c0_i32 = arith.constant 0 : i32
    %c0_i32_0 = arith.constant 0 : i32
    %c0_i32_1 = arith.constant 0 : i32
    return %c0_i32, %c0_i32_0 : i32, i32
  }
  func.func @transform_2(%arg0: i32, %arg1: i32) -> (i32, i32) {
    %c0_i32 = arith.constant 0 : i32
    %c0_i32_0 = arith.constant 0 : i32
    %c0_i32_1 = arith.constant 0 : i32
    return %c0_i32, %c0_i32_0 : i32, i32
  }
  func.func @transform_3(%arg0: i32, %arg1: i32) -> (i32, i32) {
    %c0_i32 = arith.constant 0 : i32
    %c0_i32_0 = arith.constant 0 : i32
    return %c0_i32, %arg1 : i32, i32
  }
  func.func @transform_4(%arg0: i32, %arg1: i32) -> (i32, i32) {
    %c0_i32 = arith.constant 0 : i32
    %c0_i32_0 = arith.constant 0 : i32
    return %c0_i32, %arg1 : i32, i32
  }
  func.func @transform_5(%arg0: i32, %arg1: i32) -> (i32, i32) {
    %c0_i32 = arith.constant 0 : i32
    return %arg0, %arg1 : i32, i32
  }
}

module attributes {stable_mosaic.version = 11 : i64} {
  func.func @_linear_act_kernel(%arg0: i32, %arg1: i32, %arg2: i32, %arg3: memref<16x256xbf16, #tpu.memory_space<vmem>>, %arg4: memref<256x128xbf16, #tpu.memory_space<vmem>>, %arg5: memref<1x128xf32, #tpu.memory_space<vmem>>, %arg6: memref<16x128xbf16, #tpu.memory_space<vmem>>, %arg7: memref<16x128xf32, #tpu.memory_space<vmem>>) attributes {dimension_semantics = [#tpu.dimension_semantics<parallel>, #tpu.dimension_semantics<parallel>, #tpu.dimension_semantics<arbitrary>], iteration_bounds = array<i64: 1, 1, 1>, scalar_prefetch = 0 : i64, scratch_operands = 1 : i64, tpu.core_type = #tpu.core_type<tc>, window_params = [{transform_indices = @transform_0, window_bounds = array<i64: 16, 256>}, {transform_indices = @transform_1, window_bounds = array<i64: 256, 128>}, {transform_indices = @transform_2, window_bounds = array<i64: 1, 128>}, {transform_indices = @transform_3, window_bounds = array<i64: 16, 128>}]} {
    %c0_i32 = arith.constant 0 : i32
    %0 = arith.cmpi eq, %arg2, %c0_i32 : i32
    %1 = arith.extui %0 : i1 to i32
    %c0_i32_0 = arith.constant 0 : i32
    %2 = arith.cmpi ne, %1, %c0_i32_0 : i32
    scf.if %2 {
      %cst_10 = arith.constant 0.000000e+00 : f32
      %12 = vector.broadcast %cst_10 : f32 to vector<16x128xf32>
      %c0_11 = arith.constant 0 : index
      %c0_12 = arith.constant 0 : index
      %13 = vector.load %arg7[%c0_11, %c0_12] : memref<16x128xf32, #tpu.memory_space<vmem>>, vector<16x128xf32>
      tpu.vector_store %arg7[%c0_11, %c0_12], %12 {strides = array<i32>} : memref<16x128xf32, #tpu.memory_space<vmem>>, vector<16x128xf32>,
    } else {
    }
    %c0 = arith.constant 0 : index
    %c0_1 = arith.constant 0 : index
    %3 = vector.load %arg7[%c0, %c0_1] : memref<16x128xf32, #tpu.memory_space<vmem>>, vector<16x128xf32>
    %c0_2 = arith.constant 0 : index
    %c0_3 = arith.constant 0 : index
    %4 = vector.load %arg3[%c0_2, %c0_3] : memref<16x256xbf16, #tpu.memory_space<vmem>>, vector<16x256xbf16>
    %c0_4 = arith.constant 0 : index
    %c0_5 = arith.constant 0 : index
    %5 = vector.load %arg4[%c0_4, %c0_5] : memref<256x128xbf16, #tpu.memory_space<vmem>>, vector<256x128xbf16>
    %cst = arith.constant dense<0.000000e+00> : vector<16x128xf32>
    %6 = tpu.matmul %4, %5, %cst {dimension_numbers = #tpu.dot_dimension_numbers<[1], [0], [0], [1], [0, 0, 1, 1], [], []>} : vector<16x256xbf16>, vector<256x128xbf16>, vector<16x128xf32> -> vector<16x128xf32>
    %7 = arith.addf %3, %6 : vector<16x128xf32>
    %c0_6 = arith.constant 0 : index
    %c0_7 = arith.constant 0 : index
    %8 = vector.load %arg7[%c0_6, %c0_7] : memref<16x128xf32, #tpu.memory_space<vmem>>, vector<16x128xf32>
    tpu.vector_store %arg7[%c0_6, %c0_7], %7 {strides = array<i32>} : memref<16x128xf32, #tpu.memory_space<vmem>>, vector<16x128xf32>,
    %c0_i32_8 = arith.constant 0 : i32
    %9 = arith.cmpi eq, %arg2, %c0_i32_8 : i32
    %10 = arith.extui %9 : i1 to i32
    %c0_i32_9 = arith.constant 0 : i32
    %11 = arith.cmpi ne, %10, %c0_i32_9 : i32
    scf.if %11 {
      %c0_10 = arith.constant 0 : index
      %c0_11 = arith.constant 0 : index
      %12 = vector.load %arg7[%c0_10, %c0_11] : memref<16x128xf32, #tpu.memory_space<vmem>>, vector<16x128xf32>
      %c0_12 = arith.constant 0 : index
      %c0_13 = arith.constant 0 : index
      %13 = vector.load %arg5[%c0_12, %c0_13] : memref<1x128xf32, #tpu.memory_space<vmem>>, vector<1x128xf32>
      %14 = vector.broadcast %13 : vector<1x128xf32> to vector<16x128xf32>
      %15 = arith.addf %12, %14 : vector<16x128xf32>
      %cst_14 = arith.constant 0.000000e+00 : f32
      %16 = vector.broadcast %cst_14 : f32 to vector<16x128xf32>
      %17 = arith.maximumf %15, %16 : vector<16x128xf32>
      %18 = arith.truncf %17 : vector<16x128xf32> to vector<16x128xbf16>
      %c0_15 = arith.constant 0 : index
      %c0_16 = arith.constant 0 : index
      %19 = vector.load %arg6[%c0_15, %c0_16] : memref<16x128xbf16, #tpu.memory_space<vmem>>, vector<16x128xbf16>
      tpu.vector_store %arg6[%c0_15, %c0_16], %18 {strides = array<i32>} : memref<16x128xbf16, #tpu.memory_space<vmem>>, vector<16x128xbf16>,
    } else {
    }
    return
  }
  func.func @transform_0(%arg0: i32, %arg1: i32, %arg2: i32) -> (i32, i32) {
    %c0_i32 = arith.constant 0 : i32
    return %arg0, %arg2 : i32, i32
  }
  func.func @transform_1(%arg0: i32, %arg1: i32, %arg2: i32) -> (i32, i32) {
    %c0_i32 = arith.constant 0 : i32
    return %arg2, %arg1 : i32, i32
  }
  func.func @transform_2(%arg0: i32, %arg1: i32, %arg2: i32) -> (i32, i32) {
    %c0_i32 = arith.constant 0 : i32
    %c0_i32_0 = arith.constant 0 : i32
    return %c0_i32, %arg1 : i32, i32
  }
  func.func @transform_3(%arg0: i32, %arg1: i32, %arg2: i32) -> (i32, i32) {
    %c0_i32 = arith.constant 0 : i32
    return %arg0, %arg1 : i32, i32
  }
}

</mosaic_0001>

<bundles_post_ra>
// kernel: tpu_custom_call.1
= control target key start
LH: loop header
LB: loop body
LE: loop exit
PB: predicated region body
PF: predicated region fallthrough
CT: control target
= control target key end

     0   :  { %10 = vsyncpa [#allocation4], 0  ;;  %s737_s0 = inlined_call_operand.hbm [shape: bf16[16,256], index: 0, kind: input, shape index: {}]   ;;  %s738_s1 = inlined_call_operand.hbm [shape: bf16[256,128], index: 1, kind: input, shape index: {}]   ;;  %s739_s2 = inlined_call_operand.vmem [shape: f32[1,128], index: 2, kind: input, shape index: {}]   ;;  %s740_s3 = inlined_call_operand.hbm [shape: bf16[128,256], index: 3, kind: input, shape index: {}]   ;;  %s741_s4 = inlined_call_operand.vmem [shape: f32[1,256], index: 4, kind: input, shape index: {}]   ;;  %s742_s5 = inlined_call_operand.hbm [shape: f32[16,256], index: 5, kind: output, shape index: {}]  }
   0x1   :  { %11 = vsyncpa [#allocation7], 0 }
   0x2   :  { %12 = vsyncpa [#allocation5], 0  ;;  %s642_s18 = smov [#allocation6]   ;;  %s548_s22 = scalar_lea.hbm %s738_s1, 2048 }
   0x3   :  { %s30_s19 = sshll.u32 %s642_s18, 4  ;;  %p549_p0 = scmp.ne.s32.totalorder %s738_s1, %s548_s22  ;;  %s31_s19 = int_to_ptr.vmem [resolvable:$true] %s30_s19 }
   0x4   :  { %p552_p1 = scmp.lt.u32.totalorder %s548_s22, %s738_s1 }
   0x6   :  { %p554_p2 = pnand %p552_p1, %p549_p0 }
   0x8   :  { %557 = shalt.err (!%p554_p2)
}
   0x9   :  { %s558_s27 = scalar_lea.vmem %s31_s19, 2048  ;;  %p563_p4 = scmp.lt.s32.totalorder %s31_s19, %s31_s19 }
   0xa   :  { %p559_p3 = scmp.ne.s32.totalorder %s31_s19, %s558_s27  ;;  %p564_p5 = scmp.lt.s32.totalorder %s558_s27, %s558_s27 }
   0xc   :  { %p565_p6 = por %p564_p5, %p563_p4 }
   0xe   :  { %p566_p7 = pnand %p565_p6, %p559_p3 }
  0x10   :  { %569 = shalt.err (!%p566_p7)
}
  0x11   :  { %s643_s28 = smov 64   ;;  %s644_s29 = smov 4  }
  0x12   :  { %36 = dma.hbm_to_vmem [thread:$0]  %s738_s1, 2048, %s31_s19, [#allocation7], %s643_s28, %s643_s28, %s644_s29  }
  0x13   :  { %s645_s7 = smov [#allocation3]   ;;  %s570_s11 = scalar_lea.hbm %s737_s0, 256 }
  0x14   :  { %s18_s8 = sshll.u32 %s645_s7, 4  ;;  %p571_p8 = scmp.ne.s32.totalorder %s737_s0, %s570_s11  ;;  %s19_s8 = int_to_ptr.vmem [resolvable:$true] %s18_s8 }
  0x15   :  { %p574_p9 = scmp.lt.u32.totalorder %s570_s11, %s737_s0 }
  0x17   :  { %p576_p10 = pnand %p574_p9, %p571_p8 }
  0x19   :  { %579 = shalt.err (!%p576_p10)
}
  0x1a   :  { %s580_s16 = scalar_lea.vmem %s19_s8, 256  ;;  %p585_p12 = scmp.lt.s32.totalorder %s19_s8, %s19_s8 }
  0x1b   :  { %p581_p11 = scmp.ne.s32.totalorder %s19_s8, %s580_s16  ;;  %p586_p13 = scmp.lt.s32.totalorder %s580_s16, %s580_s16 }
  0x1d   :  { %p587_p0 = por %p586_p13, %p585_p12 }
  0x1f   :  { %p588_p1 = pnand %p587_p0, %p581_p11 }
  0x21   :  { %591 = shalt.err (!%p588_p1)
}
  0x22   :  { %s646_s1 = smov 128   ;;  %s647_s17 = smov 8  }
  0x23   :  { %24 = dma.hbm_to_vmem [thread:$0]  %s737_s0, 256, %s19_s8, [#allocation4], %s646_s1, %s646_s1, %s647_s17  }
  0x24   :  { %s648_s20 = smov [#allocation8]   ;;  %s592_s24 = scalar_lea.hbm %s740_s3, 2048 }
  0x25   :  { %s44_s21 = sshll.u32 %s648_s20, 4  ;;  %p593_p2 = scmp.ne.s32.totalorder %s740_s3, %s592_s24  ;;  %s45_s21 = int_to_ptr.vmem [resolvable:$true] %s44_s21 }
  0x26   :  { %p596_p3 = scmp.lt.u32.totalorder %s592_s24, %s740_s3 }
  0x28   :  { %p598_p4 = pnand %p596_p3, %p593_p2 }
  0x2a   :  { %601 = shalt.err (!%p598_p4)
}
  0x2b   :  { %s602_s29 = scalar_lea.vmem %s45_s21, 2048  ;;  %p607_p6 = scmp.lt.s32.totalorder %s45_s21, %s45_s21 }
  0x2c   :  { %p603_p5 = scmp.ne.s32.totalorder %s45_s21, %s602_s29  ;;  %p608_p7 = scmp.lt.s32.totalorder %s602_s29, %s602_s29 }
  0x2e   :  { %p609_p8 = por %p608_p7, %p607_p6 }
  0x30   :  { %p610_p9 = pnand %p609_p8, %p603_p5 }
  0x32   :  { %613 = shalt.err (!%p610_p9)
}
  0x33   :  { %50 = dma.hbm_to_vmem [thread:$0]  %s740_s3, 2048, %s45_s21, [#allocation7], %s646_s1, %s646_s1, %s647_s17  }
  0x34   :  { %636 = dma.done.wait [#allocation4], 256  }
  0x35   :  { %637 = vsyncadd [#allocation4], 4294967040 }
  0x36   :  { %638 = dma.done.wait [#allocation7], 4096  }
  0x37   :  { %639 = vsyncadd [#allocation7], 4294963200  ;;  %v505_v0 = vld [vmem:[#allocation6 + $0x40] sm:$0xff]   ;;  %v507_v2 = vld [vmem:[#allocation6 + $0x48] sm:$0xff]   ;;  %v649_v34 = vmov 0   ;;  %v278_v47 = vlaneseq }
  0x38   :  { %v506_v1 = vld [vmem:[#allocation6] sm:$0xff]   ;;  %472 = vmatprep.subr.bf16.mxu0 %v505_v0  ;;  %v508_v3 = vld [vmem:[#allocation6 + $0x8] sm:$0xff]   ;;  %v509_v4 = vld [vmem:[#allocation6 + $0x50] sm:$0xff]   ;;  %400 = vmatprep.mubr.bf16.mxu1 %v649_v34 }
  0x39   :  { %473 = vmatpush3.bf16.msra.mxu0 %v506_v1  ;;  %v510_v5 = vld [vmem:[#allocation6 + $0x10] sm:$0xff]   ;;  %v511_v6 = vld [vmem:[#allocation6 + $0x58] sm:$0xff]   ;;  %v513_v8 = vld [vmem:[#allocation6 + $0x60] sm:$0xff]   ;;  %v279_v48 = vshrl.u32 %v278_v47, 7 }
  0x3a   :  { %474 = vmatprep.subr.bf16.mxu0 %v507_v2  ;;  %v512_v7 = vld [vmem:[#allocation6 + $0x18] sm:$0xff]   ;;  %v514_v9 = vld [vmem:[#allocation6 + $0x20] sm:$0xff]   ;;  %v515_v10 = vld [vmem:[#allocation6 + $0x68] sm:$0xff]  }
  0x3b   :  { %v523_v11 = vld [vmem:[#allocation3 + $0x4] ss:$8 sps:$4 sm:$0xff]   ;;  %v524_v12 = vld [vmem:[#allocation8 + $0x4] ss:$8 sps:$4 sm:$0xff]   ;;  %v526_v13 = vld [vmem:[#allocation8] ss:$8 sps:$4 sm:$0xff]  }
  0x3c   :  { %v516_v14 = vld [vmem:[#allocation6 + $0x28] sm:$0xff]   ;;  %246 = vmatprep.mubr.bf16.mxu0 %v523_v11  ;;  %v527_v15 = vld [vmem:[#allocation8 + $0x14] ss:$8 sps:$4 sm:$0xff]   ;;  %368 = vmatprep.subr.bf16.mxu1 %v524_v12  ;;  %v529_v17 = vld [vmem:[#allocation8 + $0x10] ss:$8 sps:$4 sm:$0xff]   ;;  %v280_v49 = vsub.s32 0, %v279_v48 }
  0x3d   :  { %475 = vmatpush3.bf16.msra.mxu0 %v508_v3  ;;  %v517_v16 = vld [vmem:[#allocation6 + $0x70] sm:$0xff]   ;;  %369 = vmatpush1.bf16.msra.mxu1 %v526_v13  ;;  %v530_v19 = vld [vmem:[#allocation8 + $0x24] ss:$8 sps:$4 sm:$0xff]   ;;  %v519_v20 = vld [vmem:[#allocation6 + $0x78] sm:$0xff]   ;;  %v284_v51 = vsub.s32 1, %v279_v48 }
  0x3e   :  { %476 = vmatprep.subr.bf16.mxu0 %v509_v4  ;;  %v518_v18 = vld [vmem:[#allocation6 + $0x30] sm:$0xff]   ;;  %370 = vmatprep.subr.bf16.mxu1 %v527_v15  ;;  %v532_v21 = vld [vmem:[#allocation8 + $0x20] ss:$8 sps:$4 sm:$0xff]   ;;  %v520_v23 = vld [vmem:[#allocation6 + $0x38] sm:$0xff]  }
  0x3f   :  { %v533_v22 = vld [vmem:[#allocation8 + $0x34] ss:$8 sps:$4 sm:$0xff]   ;;  %v535_v24 = vld [vmem:[#allocation8 + $0x30] ss:$8 sps:$4 sm:$0xff]   ;;  %v536_v26 = vld [vmem:[#allocation8 + $0x44] ss:$8 sps:$4 sm:$0xff]  }
  0x40   :  { %v521_v25 = vld [vmem:[#allocation3] ss:$8 sps:$4 sm:$0xff]   ;;  %v538_v27 = vld [vmem:[#allocation8 + $0x40] ss:$8 sps:$4 sm:$0xff]   ;;  %v539_v28 = vld [vmem:[#allocation8 + $0x54] ss:$8 sps:$4 sm:$0xff]  }
  0x41   :  { %477 = vmatpush3.bf16.msra.mxu0 %v510_v5  ;;  %371 = vmatpush1.bf16.msra.mxu1 %v529_v17  ;;  %v541_v29 = vld [vmem:[#allocation8 + $0x50] ss:$8 sps:$4 sm:$0xff]   ;;  %v542_v30 = vld [vmem:[#allocation8 + $0x64] ss:$8 sps:$4 sm:$0xff]   ;;  %v544_v31 = vld [vmem:[#allocation8 + $0x60] ss:$8 sps:$4 sm:$0xff]  }
  0x42   :  { %478 = vmatprep.subr.bf16.mxu0 %v511_v6  ;;  %372 = vmatprep.subr.bf16.mxu1 %v530_v19  ;;  %v545_v32 = vld [vmem:[#allocation8 + $0x74] ss:$8 sps:$4 sm:$0xff]   ;;  %v547_v33 = vld [vmem:[#allocation8 + $0x70] ss:$8 sps:$4 sm:$0xff]  }
  0x43   :  { %v437_v36 = vld [vmem:[%s739_s2] ss:$0 sm:$0xff]  ;;  %s650_s2 = smov [#allocation9]  }
  0x44   :  { %v276_v50 = vld [vmem:[%s741_s4] sm:$0x3]  ;;  %s424_s9 = sshll.u32 %s650_s2, 4  ;;  %s425_s9 = int_to_ptr.vmem [resolvable:$true] %s424_s9 }
  0x45   :  { %479 = vmatpush3.bf16.msra.mxu0 %v512_v7  ;;  %373 = vmatpush1.bf16.msra.mxu1 %v532_v21  ;;  %v281_v52 = vrot.slane %v276_v50, %v280_v49  ;;  %v285_v53 = vrot.slane %v276_v50, %v284_v51  ;;  %s614_s4 = scalar_lea.vmem %s425_s9, 512  ;;  %p619_p11 = scmp.lt.s32.totalorder %s425_s9, %s425_s9 }
  0x46   :  { %480 = vmatprep.subr.bf16.mxu0 %v513_v8  ;;  %374 = vmatprep.subr.bf16.mxu1 %v533_v22  ;;  %p615_p10 = scmp.ne.s32.totalorder %s425_s9, %s614_s4  ;;  %p620_p12 = scmp.lt.s32.totalorder %s614_s4, %s614_s4 }
  0x48   :  { %p621_p13 = por %p620_p12, %p619_p11 }
  0x49   :  { %481 = vmatpush3.bf16.msra.mxu0 %v514_v9  ;;  %375 = vmatpush1.bf16.msra.mxu1 %v535_v24 }
  0x4a   :  { %482 = vmatprep.subr.bf16.mxu0 %v515_v10  ;;  %376 = vmatprep.subr.bf16.mxu1 %v536_v26  ;;  %p622_p0 = pnand %p621_p13, %p615_p10 }
  0x4d   :  { %483 = vmatpush3.bf16.msra.mxu0 %v516_v14  ;;  %377 = vmatpush1.bf16.msra.mxu1 %v538_v27 }
  0x4e   :  { %484 = vmatprep.subr.bf16.mxu0 %v517_v16  ;;  %378 = vmatprep.subr.bf16.mxu1 %v539_v28 }
  0x51   :  { %485 = vmatpush3.bf16.msra.mxu0 %v518_v18  ;;  %379 = vmatpush1.bf16.msra.mxu1 %v541_v29 }
  0x52   :  { %486 = vmatprep.subr.bf16.mxu0 %v519_v20  ;;  %380 = vmatprep.subr.bf16.mxu1 %v542_v30 }
  0x55   :  { %487 = vmatpush3.bf16.msra.mxu0 %v520_v23  ;;  %381 = vmatpush1.bf16.msra.mxu1 %v544_v31 }
  0x56   :  { %382 = vmatprep.subr.bf16.mxu1 %v545_v32 }
  0x58   :  { %247 = vmatmul.mubr.bf16.vlgmr.msra.gmra.mrb[0].mxu0 %v521_v25 }
  0x59   :  { %383 = vmatpush1.bf16.msra.mxu1 %v547_v33 }
 0x12b   :  { %v488_v35 = vpop.f32.mrb[0].mxu0 }
 0x12c   :  { %v489_v37 = vpop.f32.mrb[1].mxu0 }
 0x12d   :  { %v490_v38 = vadd.f32 %v489_v37, %v488_v35  ;;  %v491_v39 = vpop.f32.mrb[2].mxu0 }
 0x12e   :  { %v492_v40 = vpop.f32.mrb[3].mxu0 }
 0x12f   :  { %v249_v41 = vadd.f32 %v490_v38, %v437_v36  ;;  %v493_v42 = vadd.f32 %v492_v40, %v491_v39 }
 0x131   :  { %v252_v43 = vadd.f32 %v493_v42, %v437_v36  ;;  %v255_v44 = vmax.f32 %v249_v41, 0.0 }
 0x133   :  { %v256_v45 = vmax.f32 %v252_v43, 0.0 }
 0x135   :  { %v257_v46 = vpack.c.bf16 %v256_v45, %v255_v44 }
 0x137   :  { %401 = vmatmul.mubr.bf16.vlgmr.msra.gmra.mrb[0].mxu1 %v257_v46 }
 0x20a   :  { %v402_v54 = vpop.f32.mrb[0].mxu1 }
 0x20b   :  { %v403_v55 = vadd.f32 %v402_v54, %v281_v52  ;;  %v404_v56 = vpop.f32.mrb[1].mxu1 }
 0x20c   :  { %v405_v57 = vadd.f32 %v404_v56, %v285_v53  ;;  %v406_v58 = vpop.f32.mrb[2].mxu1 }
 0x20d   :  { %v411_v59 = vmax.f32 %v403_v55, 0.0  ;;  %v407_v60 = vadd.f32 %v406_v58, %v281_v52  ;;  %v408_v61 = vpop.f32.mrb[3].mxu1 }
 0x20e   :  { %v412_v62 = vmax.f32 %v405_v57, 0.0  ;;  %v409_v63 = vadd.f32 %v408_v61, %v285_v53 }
 0x20f   :  { %415 = vst [vmem:[#allocation9] sm:$0xff] %v411_v59  ;;  %v413_v0 = vmax.f32 %v407_v60, 0.0 }
 0x210   :  { %416 = vst [vmem:[#allocation9 + $0x8] sm:$0xff] %v412_v62  ;;  %v414_v1 = vmax.f32 %v409_v63, 0.0 }
 0x211   :  { %417 = vst [vmem:[#allocation9 + $0x10] sm:$0xff] %v413_v0 }
 0x212   :  { %418 = vst [vmem:[#allocation9 + $0x18] sm:$0xff] %v414_v1 }
 0x213   :  { %625 = shalt.err (!%p622_p0)
}
 0x214   :  { %s626_s12 = scalar_lea.hbm %s742_s5, 512 }
 0x215   :  { %p627_p1 = scmp.ne.s32.totalorder %s742_s5, %s626_s12  ;;  %p630_p2 = scmp.lt.u32.totalorder %s626_s12, %s742_s5 }
 0x217   :  { %p632_p3 = pnand %p630_p2, %p627_p1 }
 0x219   :  { %635 = shalt.err (!%p632_p3)
}
 0x21a   :  { %s651_s1 = smov 256   ;;  %s652_s17 = smov 16  }
 0x21b   :  { %430 = dma.vmem_to_hbm [thread:$0]  %s425_s9, 512, %s742_s5, [#allocation5], %s651_s1, %s651_s1, %s652_s17  }
 0x21c   :  { %640 = dma.done.wait [#allocation5], 512  }
 0x21d   :  { %641 = vsyncadd [#allocation5], 4294966784 }
 0x21e   :  { %434 = vsyncpa [#allocation4], 1 }
 0x21f   :  { %435 = vsyncpa [#allocation7], 1 }
 0x220   :  { %436 = vsyncpa [#allocation5], 1 }

// kernel: tpu_custom_call.1
= control target key start
LH: loop header
LB: loop body
LE: loop exit
PB: predicated region body
PF: predicated region fallthrough
CT: control target
= control target key end

     0   :  { %10 = vsyncpa [#allocation4], 0  ;;  %s737_s0 = inlined_call_operand.hbm [shape: bf16[16,256], index: 0, kind: input, shape index: {}]   ;;  %s738_s1 = inlined_call_operand.hbm [shape: bf16[256,128], index: 1, kind: input, shape index: {}]   ;;  %s739_s2 = inlined_call_operand.vmem [shape: f32[1,128], index: 2, kind: input, shape index: {}]   ;;  %s740_s3 = inlined_call_operand.hbm [shape: bf16[128,256], index: 3, kind: input, shape index: {}]   ;;  %s741_s4 = inlined_call_operand.vmem [shape: f32[1,256], index: 4, kind: input, shape index: {}]   ;;  %s742_s5 = inlined_call_operand.hbm [shape: f32[16,256], index: 5, kind: output, shape index: {}]  }
   0x1   :  { %11 = vsyncpa [#allocation7], 0 }
   0x2   :  { %12 = vsyncpa [#allocation5], 0  ;;  %s642_s18 = smov [#allocation6]   ;;  %s548_s22 = scalar_lea.hbm %s738_s1, 2048 }
   0x3   :  { %s30_s19 = sshll.u32 %s642_s18, 4  ;;  %p549_p0 = scmp.ne.s32.totalorder %s738_s1, %s548_s22  ;;  %s31_s19 = int_to_ptr.vmem [resolvable:$true] %s30_s19 }
   0x4   :  { %p552_p1 = scmp.lt.u32.totalorder %s548_s22, %s738_s1 }
   0x6   :  { %p554_p2 = pnand %p552_p1, %p549_p0 }
   0x8   :  { %557 = shalt.err (!%p554_p2)
}
   0x9   :  { %s558_s27 = scalar_lea.vmem %s31_s19, 2048  ;;  %p563_p4 = scmp.lt.s32.totalorder %s31_s19, %s31_s19 }
   0xa   :  { %p559_p3 = scmp.ne.s32.totalorder %s31_s19, %s558_s27  ;;  %p564_p5 = scmp.lt.s32.totalorder %s558_s27, %s558_s27 }
   0xc   :  { %p565_p6 = por %p564_p5, %p563_p4 }
   0xe   :  { %p566_p7 = pnand %p565_p6, %p559_p3 }
  0x10   :  { %569 = shalt.err (!%p566_p7)
}
  0x11   :  { %s643_s28 = smov 64   ;;  %s644_s29 = smov 4  }
  0x12   :  { %36 = dma.hbm_to_vmem [thread:$0]  %s738_s1, 2048, %s31_s19, [#allocation7], %s643_s28, %s643_s28, %s644_s29  }
  0x13   :  { %s645_s7 = smov [#allocation3]   ;;  %s570_s11 = scalar_lea.hbm %s737_s0, 256 }
  0x14   :  { %s18_s8 = sshll.u32 %s645_s7, 4  ;;  %p571_p8 = scmp.ne.s32.totalorder %s737_s0, %s570_s11  ;;  %s19_s8 = int_to_ptr.vmem [resolvable:$true] %s18_s8 }
  0x15   :  { %p574_p9 = scmp.lt.u32.totalorder %s570_s11, %s737_s0 }
  0x17   :  { %p576_p10 = pnand %p574_p9, %p571_p8 }
  0x19   :  { %579 = shalt.err (!%p576_p10)
}
  0x1a   :  { %s580_s16 = scalar_lea.vmem %s19_s8, 256  ;;  %p585_p12 = scmp.lt.s32.totalorder %s19_s8, %s19_s8 }
  0x1b   :  { %p581_p11 = scmp.ne.s32.totalorder %s19_s8, %s580_s16  ;;  %p586_p13 = scmp.lt.s32.totalorder %s580_s16, %s580_s16 }
  0x1d   :  { %p587_p0 = por %p586_p13, %p585_p12 }
  0x1f   :  { %p588_p1 = pnand %p587_p0, %p581_p11 }
  0x21   :  { %591 = shalt.err (!%p588_p1)
}
  0x22   :  { %s646_s1 = smov 128   ;;  %s647_s17 = smov 8  }
  0x23   :  { %24 = dma.hbm_to_vmem [thread:$0]  %s737_s0, 256, %s19_s8, [#allocation4], %s646_s1, %s646_s1, %s647_s17  }
  0x24   :  { %s648_s20 = smov [#allocation8]   ;;  %s592_s24 = scalar_lea.hbm %s740_s3, 2048 }
  0x25   :  { %s44_s21 = sshll.u32 %s648_s20, 4  ;;  %p593_p2 = scmp.ne.s32.totalorder %s740_s3, %s592_s24  ;;  %s45_s21 = int_to_ptr.vmem [resolvable:$true] %s44_s21 }
  0x26   :  { %p596_p3 = scmp.lt.u32.totalorder %s592_s24, %s740_s3 }
  0x28   :  { %p598_p4 = pnand %p596_p3, %p593_p2 }
  0x2a   :  { %601 = shalt.err (!%p598_p4)
}
  0x2b   :  { %s602_s29 = scalar_lea.vmem %s45_s21, 2048  ;;  %p607_p6 = scmp.lt.s32.totalorder %s45_s21, %s45_s21 }
  0x2c   :  { %p603_p5 = scmp.ne.s32.totalorder %s45_s21, %s602_s29  ;;  %p608_p7 = scmp.lt.s32.totalorder %s602_s29, %s602_s29 }
  0x2e   :  { %p609_p8 = por %p608_p7, %p607_p6 }
  0x30   :  { %p610_p9 = pnand %p609_p8, %p603_p5 }
  0x32   :  { %613 = shalt.err (!%p610_p9)
}
  0x33   :  { %50 = dma.hbm_to_vmem [thread:$0]  %s740_s3, 2048, %s45_s21, [#allocation7], %s646_s1, %s646_s1, %s647_s17  }
  0x34   :  { %636 = dma.done.wait [#allocation4], 256  }
  0x35   :  { %637 = vsyncadd [#allocation4], 4294967040 }
  0x36   :  { %638 = dma.done.wait [#allocation7], 4096  }
  0x37   :  { %639 = vsyncadd [#allocation7], 4294963200  ;;  %v505_v0 = vld [vmem:[#allocation6 + $0x40] sm:$0xff]   ;;  %v507_v2 = vld [vmem:[#allocation6 + $0x48] sm:$0xff]   ;;  %v649_v34 = vmov 0   ;;  %v278_v47 = vlaneseq }
  0x38   :  { %v506_v1 = vld [vmem:[#allocation6] sm:$0xff]   ;;  %472 = vmatprep.subr.bf16.mxu0 %v505_v0  ;;  %v508_v3 = vld [vmem:[#allocation6 + $0x8] sm:$0xff]   ;;  %v509_v4 = vld [vmem:[#allocation6 + $0x50] sm:$0xff]   ;;  %400 = vmatprep.mubr.bf16.mxu1 %v649_v34 }
  0x39   :  { %473 = vmatpush3.bf16.msra.mxu0 %v506_v1  ;;  %v510_v5 = vld [vmem:[#allocation6 + $0x10] sm:$0xff]   ;;  %v511_v6 = vld [vmem:[#allocation6 + $0x58] sm:$0xff]   ;;  %v513_v8 = vld [vmem:[#allocation6 + $0x60] sm:$0xff]   ;;  %v279_v48 = vshrl.u32 %v278_v47, 7 }
  0x3a   :  { %474 = vmatprep.subr.bf16.mxu0 %v507_v2  ;;  %v512_v7 = vld [vmem:[#allocation6 + $0x18] sm:$0xff]   ;;  %v514_v9 = vld [vmem:[#allocation6 + $0x20] sm:$0xff]   ;;  %v515_v10 = vld [vmem:[#allocation6 + $0x68] sm:$0xff]  }
  0x3b   :  { %v523_v11 = vld [vmem:[#allocation3 + $0x4] ss:$8 sps:$4 sm:$0xff]   ;;  %v524_v12 = vld [vmem:[#allocation8 + $0x4] ss:$8 sps:$4 sm:$0xff]   ;;  %v526_v13 = vld [vmem:[#allocation8] ss:$8 sps:$4 sm:$0xff]  }
  0x3c   :  { %v516_v14 = vld [vmem:[#allocation6 + $0x28] sm:$0xff]   ;;  %246 = vmatprep.mubr.bf16.mxu0 %v523_v11  ;;  %v527_v15 = vld [vmem:[#allocation8 + $0x14] ss:$8 sps:$4 sm:$0xff]   ;;  %368 = vmatprep.subr.bf16.mxu1 %v524_v12  ;;  %v529_v17 = vld [vmem:[#allocation8 + $0x10] ss:$8 sps:$4 sm:$0xff]   ;;  %v280_v49 = vsub.s32 0, %v279_v48 }
  0x3d   :  { %475 = vmatpush3.bf16.msra.mxu0 %v508_v3  ;;  %v517_v16 = vld [vmem:[#allocation6 + $0x70] sm:$0xff]   ;;  %369 = vmatpush1.bf16.msra.mxu1 %v526_v13  ;;  %v530_v19 = vld [vmem:[#allocation8 + $0x24] ss:$8 sps:$4 sm:$0xff]   ;;  %v519_v20 = vld [vmem:[#allocation6 + $0x78] sm:$0xff]   ;;  %v284_v51 = vsub.s32 1, %v279_v48 }
  0x3e   :  { %476 = vmatprep.subr.bf16.mxu0 %v509_v4  ;;  %v518_v18 = vld [vmem:[#allocation6 + $0x30] sm:$0xff]   ;;  %370 = vmatprep.subr.bf16.mxu1 %v527_v15  ;;  %v532_v21 = vld [vmem:[#allocation8 + $0x20] ss:$8 sps:$4 sm:$0xff]   ;;  %v520_v23 = vld [vmem:[#allocation6 + $0x38] sm:$0xff]  }
  0x3f   :  { %v533_v22 = vld [vmem:[#allocation8 + $0x34] ss:$8 sps:$4 sm:$0xff]   ;;  %v535_v24 = vld [vmem:[#allocation8 + $0x30] ss:$8 sps:$4 sm:$0xff]   ;;  %v536_v26 = vld [vmem:[#allocation8 + $0x44] ss:$8 sps:$4 sm:$0xff]  }
  0x40   :  { %v521_v25 = vld [vmem:[#allocation3] ss:$8 sps:$4 sm:$0xff]   ;;  %v538_v27 = vld [vmem:[#allocation8 + $0x40] ss:$8 sps:$4 sm:$0xff]   ;;  %v539_v28 = vld [vmem:[#allocation8 + $0x54] ss:$8 sps:$4 sm:$0xff]  }
  0x41   :  { %477 = vmatpush3.bf16.msra.mxu0 %v510_v5  ;;  %371 = vmatpush1.bf16.msra.mxu1 %v529_v17  ;;  %v541_v29 = vld [vmem:[#allocation8 + $0x50] ss:$8 sps:$4 sm:$0xff]   ;;  %v542_v30 = vld [vmem:[#allocation8 + $0x64] ss:$8 sps:$4 sm:$0xff]   ;;  %v544_v31 = vld [vmem:[#allocation8 + $0x60] ss:$8 sps:$4 sm:$0xff]  }
  0x42   :  { %478 = vmatprep.subr.bf16.mxu0 %v511_v6  ;;  %372 = vmatprep.subr.bf16.mxu1 %v530_v19  ;;  %v545_v32 = vld [vmem:[#allocation8 + $0x74] ss:$8 sps:$4 sm:$0xff]   ;;  %v547_v33 = vld [vmem:[#allocation8 + $0x70] ss:$8 sps:$4 sm:$0xff]  }
  0x43   :  { %v437_v36 = vld [vmem:[%s739_s2] ss:$0 sm:$0xff]  ;;  %s650_s2 = smov [#allocation9]  }
  0x44   :  { %v276_v50 = vld [vmem:[%s741_s4] sm:$0x3]  ;;  %s424_s9 = sshll.u32 %s650_s2, 4  ;;  %s425_s9 = int_to_ptr.vmem [resolvable:$true] %s424_s9 }
  0x45   :  { %479 = vmatpush3.bf16.msra.mxu0 %v512_v7  ;;  %373 = vmatpush1.bf16.msra.mxu1 %v532_v21  ;;  %v281_v52 = vrot.slane %v276_v50, %v280_v49  ;;  %v285_v53 = vrot.slane %v276_v50, %v284_v51  ;;  %s614_s4 = scalar_lea.vmem %s425_s9, 512  ;;  %p619_p11 = scmp.lt.s32.totalorder %s425_s9, %s425_s9 }
  0x46   :  { %480 = vmatprep.subr.bf16.mxu0 %v513_v8  ;;  %374 = vmatprep.subr.bf16.mxu1 %v533_v22  ;;  %p615_p10 = scmp.ne.s32.totalorder %s425_s9, %s614_s4  ;;  %p620_p12 = scmp.lt.s32.totalorder %s614_s4, %s614_s4 }
  0x48   :  { %p621_p13 = por %p620_p12, %p619_p11 }
  0x49   :  { %481 = vmatpush3.bf16.msra.mxu0 %v514_v9  ;;  %375 = vmatpush1.bf16.msra.mxu1 %v535_v24 }
  0x4a   :  { %482 = vmatprep.subr.bf16.mxu0 %v515_v10  ;;  %376 = vmatprep.subr.bf16.mxu1 %v536_v26  ;;  %p622_p0 = pnand %p621_p13, %p615_p10 }
  0x4d   :  { %483 = vmatpush3.bf16.msra.mxu0 %v516_v14  ;;  %377 = vmatpush1.bf16.msra.mxu1 %v538_v27 }
  0x4e   :  { %484 = vmatprep.subr.bf16.mxu0 %v517_v16  ;;  %378 = vmatprep.subr.bf16.mxu1 %v539_v28 }
  0x51   :  { %485 = vmatpush3.bf16.msra.mxu0 %v518_v18  ;;  %379 = vmatpush1.bf16.msra.mxu1 %v541_v29 }
  0x52   :  { %486 = vmatprep.subr.bf16.mxu0 %v519_v20  ;;  %380 = vmatprep.subr.bf16.mxu1 %v542_v30 }
  0x55   :  { %487 = vmatpush3.bf16.msra.mxu0 %v520_v23  ;;  %381 = vmatpush1.bf16.msra.mxu1 %v544_v31 }
  0x56   :  { %382 = vmatprep.subr.bf16.mxu1 %v545_v32 }
  0x58   :  { %247 = vmatmul.mubr.bf16.vlgmr.msra.gmra.mrb[0].mxu0 %v521_v25 }
  0x59   :  { %383 = vmatpush1.bf16.msra.mxu1 %v547_v33 }
 0x12b   :  { %v488_v35 = vpop.f32.mrb[0].mxu0 }
 0x12c   :  { %v489_v37 = vpop.f32.mrb[1].mxu0 }
 0x12d   :  { %v490_v38 = vadd.f32 %v489_v37, %v488_v35  ;;  %v491_v39 = vpop.f32.mrb[2].mxu0 }
 0x12e   :  { %v492_v40 = vpop.f32.mrb[3].mxu0 }
 0x12f   :  { %v249_v41 = vadd.f32 %v490_v38, %v437_v36  ;;  %v493_v42 = vadd.f32 %v492_v40, %v491_v39 }
 0x131   :  { %v252_v43 = vadd.f32 %v493_v42, %v437_v36  ;;  %v255_v44 = vmax.f32 %v249_v41, 0.0 }
 0x133   :  { %v256_v45 = vmax.f32 %v252_v43, 0.0 }
 0x135   :  { %v257_v46 = vpack.c.bf16 %v256_v45, %v255_v44 }
 0x137   :  { %401 = vmatmul.mubr.bf16.vlgmr.msra.gmra.mrb[0].mxu1 %v257_v46 }
 0x20a   :  { %v402_v54 = vpop.f32.mrb[0].mxu1 }
 0x20b   :  { %v403_v55 = vadd.f32 %v402_v54, %v281_v52  ;;  %v404_v56 = vpop.f32.mrb[1].mxu1 }
 0x20c   :  { %v405_v57 = vadd.f32 %v404_v56, %v285_v53  ;;  %v406_v58 = vpop.f32.mrb[2].mxu1 }
 0x20d   :  { %v411_v59 = vmax.f32 %v403_v55, 0.0  ;;  %v407_v60 = vadd.f32 %v406_v58, %v281_v52  ;;  %v408_v61 = vpop.f32.mrb[3].mxu1 }
 0x20e   :  { %v412_v62 = vmax.f32 %v405_v57, 0.0  ;;  %v409_v63 = vadd.f32 %v408_v61, %v285_v53 }
 0x20f   :  { %415 = vst [vmem:[#allocation9] sm:$0xff] %v411_v59  ;;  %v413_v0 = vmax.f32 %v407_v60, 0.0 }
 0x210   :  { %416 = vst [vmem:[#allocation9 + $0x8] sm:$0xff] %v412_v62  ;;  %v414_v1 = vmax.f32 %v409_v63, 0.0 }
 0x211   :  { %417 = vst [vmem:[#allocation9 + $0x10] sm:$0xff] %v413_v0 }
 0x212   :  { %418 = vst [vmem:[#allocation9 + $0x18] sm:$0xff] %v414_v1 }
 0x213   :  { %625 = shalt.err (!%p622_p0)
}
 0x214   :  { %s626_s12 = scalar_lea.hbm %s742_s5, 512 }
 0x215   :  { %p627_p1 = scmp.ne.s32.totalorder %s742_s5, %s626_s12  ;;  %p630_p2 = scmp.lt.u32.totalorder %s626_s12, %s742_s5 }
 0x217   :  { %p632_p3 = pnand %p630_p2, %p627_p1 }
 0x219   :  { %635 = shalt.err (!%p632_p3)
}
 0x21a   :  { %s651_s1 = smov 256   ;;  %s652_s17 = smov 16  }
 0x21b   :  { %430 = dma.vmem_to_hbm [thread:$0]  %s425_s9, 512, %s742_s5, [#allocation5], %s651_s1, %s651_s1, %s652_s17  }
 0x21c   :  { %640 = dma.done.wait [#allocation5], 512  }
 0x21d   :  { %641 = vsyncadd [#allocation5], 4294966784 }
 0x21e   :  { %434 = vsyncpa [#allocation4], 1 }
 0x21f   :  { %435 = vsyncpa [#allocation7], 1 }
 0x220   :  { %436 = vsyncpa [#allocation5], 1 }

// kernel: tpu_custom_call.1
= control target key start
LH: loop header
LB: loop body
LE: loop exit
PB: predicated region body
PF: predicated region fallthrough
CT: control target
= control target key end

     0   :  { %8 = vsyncpa [#allocation4], 0  ;;  %s501_s0 = inlined_call_operand.hbm [shape: bf16[16,256], index: 0, kind: input, shape index: {}]   ;;  %s502_s1 = inlined_call_operand.hbm [shape: bf16[256,128], index: 1, kind: input, shape index: {}]   ;;  %s503_s2 = inlined_call_operand.vmem [shape: f32[1,128], index: 2, kind: input, shape index: {}]   ;;  %s504_s3 = inlined_call_operand.hbm [shape: bf16[16,128], index: 3, kind: output, shape index: {}]  }
   0x1   :  { %9 = vsyncpa [#allocation7], 0 }
   0x2   :  { %10 = vsyncpa [#allocation5], 0  ;;  %s429_s12 = smov [#allocation3]   ;;  %s357_s16 = scalar_lea.hbm %s501_s0, 256 }
   0x3   :  { %s16_s13 = sshll.u32 %s429_s12, 4  ;;  %p358_p0 = scmp.ne.s32.totalorder %s501_s0, %s357_s16  ;;  %s17_s13 = int_to_ptr.vmem [resolvable:$true] %s16_s13 }
   0x4   :  { %p361_p1 = scmp.lt.u32.totalorder %s357_s16, %s501_s0 }
   0x6   :  { %p363_p2 = pnand %p361_p1, %p358_p0 }
   0x8   :  { %366 = shalt.err (!%p363_p2)
}
   0x9   :  { %s367_s21 = scalar_lea.vmem %s17_s13, 256  ;;  %p372_p4 = scmp.lt.s32.totalorder %s17_s13, %s17_s13 }
   0xa   :  { %p368_p3 = scmp.ne.s32.totalorder %s17_s13, %s367_s21  ;;  %p373_p5 = scmp.lt.s32.totalorder %s367_s21, %s367_s21 }
   0xc   :  { %p374_p6 = por %p373_p5, %p372_p4 }
   0xe   :  { %p375_p7 = pnand %p374_p6, %p368_p3 }
  0x10   :  { %378 = shalt.err (!%p375_p7)
}
  0x11   :  { %s430_s22 = smov 128   ;;  %s431_s23 = smov 8  }
  0x12   :  { %22 = dma.hbm_to_vmem [thread:$0]  %s501_s0, 256, %s17_s13, [#allocation4], %s430_s22, %s430_s22, %s431_s23  }
  0x13   :  { %s432_s26 = smov [#allocation6]   ;;  %s379_s30 = scalar_lea.hbm %s502_s1, 2048 }
  0x14   :  { %s28_s27 = sshll.u32 %s432_s26, 4  ;;  %p380_p8 = scmp.ne.s32.totalorder %s502_s1, %s379_s30  ;;  %s29_s27 = int_to_ptr.vmem [resolvable:$true] %s28_s27 }
  0x15   :  { %p383_p9 = scmp.lt.u32.totalorder %s379_s30, %s502_s1 }
  0x17   :  { %p385_p10 = pnand %p383_p9, %p380_p8 }
  0x19   :  { %388 = shalt.err (!%p385_p10)
}
  0x1a   :  { %s389_s8 = scalar_lea.vmem %s29_s27, 2048  ;;  %p394_p12 = scmp.lt.s32.totalorder %s29_s27, %s29_s27 }
  0x1b   :  { %p390_p11 = scmp.ne.s32.totalorder %s29_s27, %s389_s8  ;;  %p395_p13 = scmp.lt.s32.totalorder %s389_s8, %s389_s8 }
  0x1d   :  { %p396_p0 = por %p395_p13, %p394_p12 }
  0x1f   :  { %p397_p1 = pnand %p396_p0, %p390_p11 }
  0x21   :  { %400 = shalt.err (!%p397_p1)
}
  0x22   :  { %s433_s0 = smov 64   ;;  %s434_s9 = smov 4  }
  0x23   :  { %34 = dma.hbm_to_vmem [thread:$0]  %s502_s1, 2048, %s29_s27, [#allocation7], %s433_s0, %s433_s0, %s434_s9  }
  0x24   :  { %423 = dma.done.wait [#allocation4], 256  }
  0x25   :  { %424 = vsyncadd [#allocation4], 4294967040 }
  0x26   :  { %425 = dma.done.wait [#allocation7], 2048  }
  0x27   :  { %426 = vsyncadd [#allocation7], 4294965248  ;;  %v338_v0 = vld [vmem:[#allocation6 + $0x40] sm:$0xff]   ;;  %v340_v2 = vld [vmem:[#allocation6 + $0x48] sm:$0xff]   ;;  %s435_s13 = smov [#allocation8]  }
  0x28   :  { %v339_v1 = vld [vmem:[#allocation6] sm:$0xff]   ;;  %309 = vmatprep.subr.bf16.mxu0 %v338_v0  ;;  %v341_v3 = vld [vmem:[#allocation6 + $0x8] sm:$0xff]   ;;  %v342_v4 = vld [vmem:[#allocation6 + $0x50] sm:$0xff]   ;;  %s268_s14 = sshll.u32 %s435_s13, 4  ;;  %s269_s14 = int_to_ptr.vmem [resolvable:$true] %s268_s14 }
  0x29   :  { %310 = vmatpush3.bf16.msra.mxu0 %v339_v1  ;;  %v343_v5 = vld [vmem:[#allocation6 + $0x10] sm:$0xff]   ;;  %v344_v6 = vld [vmem:[#allocation6 + $0x58] sm:$0xff]   ;;  %v346_v8 = vld [vmem:[#allocation6 + $0x60] sm:$0xff]   ;;  %s401_s15 = scalar_lea.vmem %s269_s14, 128  ;;  %p406_p3 = scmp.lt.s32.totalorder %s269_s14, %s269_s14 }
  0x2a   :  { %311 = vmatprep.subr.bf16.mxu0 %v340_v2  ;;  %v345_v7 = vld [vmem:[#allocation6 + $0x18] sm:$0xff]   ;;  %v347_v9 = vld [vmem:[#allocation6 + $0x20] sm:$0xff]   ;;  %v348_v10 = vld [vmem:[#allocation6 + $0x68] sm:$0xff]   ;;  %p402_p2 = scmp.ne.s32.totalorder %s269_s14, %s401_s15  ;;  %p407_p4 = scmp.lt.s32.totalorder %s401_s15, %s401_s15 }
  0x2b   :  { %v356_v11 = vld [vmem:[#allocation3 + $0x4] ss:$8 sps:$4 sm:$0xff]   ;;  %v349_v12 = vld [vmem:[#allocation6 + $0x28] sm:$0xff]   ;;  %v354_v17 = vld [vmem:[#allocation3] ss:$8 sps:$4 sm:$0xff]  }
  0x2c   :  { %224 = vmatprep.mubr.bf16.mxu0 %v356_v11  ;;  %v350_v13 = vld [vmem:[#allocation6 + $0x70] sm:$0xff]   ;;  %v352_v15 = vld [vmem:[#allocation6 + $0x78] sm:$0xff]   ;;  %p408_p5 = por %p407_p4, %p406_p3 }
  0x2d   :  { %312 = vmatpush3.bf16.msra.mxu0 %v341_v3  ;;  %v351_v14 = vld [vmem:[#allocation6 + $0x30] sm:$0xff]   ;;  %v353_v16 = vld [vmem:[#allocation6 + $0x38] sm:$0xff]  }
  0x2e   :  { %313 = vmatprep.subr.bf16.mxu0 %v342_v4  ;;  %v299_v20 = vld [vmem:[%s503_s2] ss:$0 sm:$0xff]  ;;  %p409_p6 = pnand %p408_p5, %p402_p2 }
  0x31   :  { %314 = vmatpush3.bf16.msra.mxu0 %v343_v5 }
  0x32   :  { %315 = vmatprep.subr.bf16.mxu0 %v344_v6 }
  0x35   :  { %316 = vmatpush3.bf16.msra.mxu0 %v345_v7 }
  0x36   :  { %317 = vmatprep.subr.bf16.mxu0 %v346_v8 }
  0x39   :  { %318 = vmatpush3.bf16.msra.mxu0 %v347_v9 }
  0x3a   :  { %319 = vmatprep.subr.bf16.mxu0 %v348_v10 }
  0x3d   :  { %320 = vmatpush3.bf16.msra.mxu0 %v349_v12 }
  0x3e   :  { %321 = vmatprep.subr.bf16.mxu0 %v350_v13 }
  0x41   :  { %322 = vmatpush3.bf16.msra.mxu0 %v351_v14 }
  0x42   :  { %323 = vmatprep.subr.bf16.mxu0 %v352_v15 }
  0x45   :  { %324 = vmatpush3.bf16.msra.mxu0 %v353_v16 }
  0x48   :  { %225 = vmatmul.mubr.bf16.vlgmr.msra.gmra.mrb[0].mxu0 %v354_v17 }
 0x11b   :  { %v325_v18 = vpop.f32.mrb[0].mxu0 }
 0x11c   :  { %v326_v19 = vpop.f32.mrb[1].mxu0 }
 0x11d   :  { %v327_v21 = vadd.f32 %v326_v19, %v325_v18  ;;  %v328_v22 = vpop.f32.mrb[2].mxu0 }
 0x11e   :  { %v329_v23 = vpop.f32.mrb[3].mxu0 }
 0x11f   :  { %v249_v24 = vadd.f32 %v327_v21, %v299_v20  ;;  %v330_v25 = vadd.f32 %v329_v23, %v328_v22 }
 0x121   :  { %v250_v26 = vadd.f32 %v330_v25, %v299_v20  ;;  %v251_v27 = vmax.f32 %v249_v24, 0.0 }
 0x123   :  { %v252_v28 = vmax.f32 %v250_v26, 0.0 }
 0x125   :  { %v307_v29 = vpack.c.bf16 %v252_v28, %v251_v27 }
 0x127   :  { %308 = vst [vmem:[#allocation8] sm:$0xff] %v307_v29  }
 0x128   :  { %412 = shalt.err (!%p409_p6)
}
 0x129   :  { %s413_s17 = scalar_lea.hbm %s504_s3, 128 }
 0x12a   :  { %p414_p7 = scmp.ne.s32.totalorder %s504_s3, %s413_s17  ;;  %p417_p8 = scmp.lt.u32.totalorder %s413_s17, %s504_s3 }
 0x12c   :  { %p419_p9 = pnand %p417_p8, %p414_p7 }
 0x12e   :  { %422 = shalt.err (!%p419_p9)
}
 0x12f   :  { %274 = dma.vmem_to_hbm [thread:$0]  %s269_s14, 128, %s504_s3, [#allocation5], %s433_s0, %s433_s0, %s434_s9  }
 0x130   :  { %427 = dma.done.wait [#allocation5], 128  }
 0x131   :  { %428 = vsyncadd [#allocation5], 4294967168 }
 0x132   :  { %278 = vsyncpa [#allocation4], 1 }
 0x133   :  { %279 = vsyncpa [#allocation7], 1 }
 0x134   :  { %280 = vsyncpa [#allocation5], 1 }

</bundles_post_ra>
